<compile_context>
chip_gen: v7x
topology: tpu7x:2x2x1
jax: 0.10.0
libtpu: 0.0.40
codegen_flags: <defaults>
</compile_context>

<pallas_src>
import jax
import jax.numpy as jnp
from jax import lax
from jax.experimental import pallas as pl
from jax.experimental.pallas import tpu as pltpu


def _round_up(x, m):
    return (x + m - 1) // m * m


# ----------------------------------------------------------------------------
# Fast path: table resident in VMEM, gather via one-hot MXU matmul.
# ----------------------------------------------------------------------------
def _emb_onehot_kernel(ids_ref, table_ref, out_ref):
    # ids_ref:   (tm, 1)  int32 VMEM block of token ids for this tile
    # table_ref: (Vp, Dp) VMEM-resident embedding table (same block every step)
    # out_ref:   (tm, Dp) output block
    tm = out_ref.shape[0]
    vp = table_ref.shape[0]
    ids = ids_ref[...]                                           # (tm, 1)
    onehot = (ids == lax.broadcasted_iota(jnp.int32, (tm, vp), 1))
    onehot = onehot.astype(table_ref.dtype)                      # (tm, Vp)
    out_ref[...] = jnp.dot(
        onehot, table_ref[...], preferred_element_type=jnp.float32
    ).astype(out_ref.dtype)


# ----------------------------------------------------------------------------
# Large-vocab path: table stays in HBM, per-row DMA gather into the out block.
# ----------------------------------------------------------------------------
def _emb_hbm_gather_kernel(ids_ref, table_ref, out_ref, copy_sem):
    # ids_ref:   (Np,)    int32 in SMEM (scalar prefetch) -- addressing only
    # table_ref: (V, Dp)  HBM (pl.ANY)                    -- never fully loaded
    # out_ref:   (tm, Dp) VMEM output block for this tile
    # copy_sem:  scalar DMA semaphore shared by all row copies of this tile
    tm = out_ref.shape[0]
    base = pl.program_id(0) * tm

    def _issue(t, carry):
        tok = ids_ref[base + t]
        pltpu.make_async_copy(
            table_ref.at[pl.ds(tok, 1), :],   # (1, Dp) row in HBM
            out_ref.at[pl.ds(t, 1), :],       # (1, Dp) row of the output tile
            copy_sem,
        ).start()
        return carry

    # Unrolled issue loop: descriptor construction is the critical path here,
    # not HBM bandwidth; unrolling lets scalar/vector-misc slots interleave.
    lax.fori_loop(0, tm, _issue, 0, unroll=8)

    # Single aggregate drain: the tm row copies above total exactly the bytes
    # of the whole output tile, so one tile-sized wait drains the semaphore
    # (removes tm-1 serialized scalar waits per grid step).
    pltpu.make_async_copy(out_ref, out_ref, copy_sem).wait()


# ----------------------------------------------------------------------------
# Wrapper
# ----------------------------------------------------------------------------
def word_emb_forward(
    review,
    table,
    *,
    tm=1024,
    onehot_max_vocab=4096,
    vmem_table_budget_bytes=8 << 20,
    force_hbm_gather=False,
):
    """review: (B, S) int token ids, table: (V, D) float -> (B, S, D)."""
    B, S = review.shape
    V, D = table.shape
    N = B * S
    dtype = table.dtype
    itemsize = jnp.dtype(dtype).itemsize
    # Sublane-pack-aware row alignment: 8 for f32, 16 for bf16, 32 for int8.
    row_align = max(8, 32 // itemsize)

    # Lane-dense rows / output: pad word_dim up to a multiple of 128.
    Dp = _round_up(D, 128)

    ids = review.reshape(-1).astype(jnp.int32)
    # torch.nn.Embedding raises on out-of-range ids; we clamp instead so a bad
    # id can never address out-of-bounds table memory (documented deviation).
    ids = jnp.clip(ids, 0, V - 1)

    # Tile size: big enough to amortise per-step overhead, but capped so the
    # grid has >= 2 steps when possible (megacore sharding on v7x).
    tm_eff = min(_round_up(tm, row_align), _round_up(N, row_align))
    if _round_up(N, row_align) // tm_eff < 2 and N > row_align:
        tm_eff = max(row_align, _round_up(pl.cdiv(N, 2), row_align))
    Np = _round_up(N, tm_eff)
    if Np != N:
        ids = jnp.pad(ids, (0, Np - N))
    grid = (Np // tm_eff,)

    table_vmem_bytes = _round_up(V, row_align) * Dp * itemsize
    use_onehot = (
        not force_hbm_gather
        and table_vmem_bytes <= vmem_table_budget_bytes
        and V <= onehot_max_vocab
    )

    if use_onehot:
        Vp = _round_up(V, row_align)
        table_p = table
        if (Vp, Dp) != (V, D):
            table_p = jnp.pad(table, ((0, Vp - V), (0, Dp - D)))
        ids2d = ids.reshape(Np, 1)

        vmem_need = (
            Vp * Dp * itemsize            # resident table (one copy)
            + 2 * tm_eff * Dp * itemsize  # double-buffered output block
            + 2 * tm_eff * 128 * 4        # (tm, 1) int32 id blocks (lane-padded)
            + (2 << 20)                   # headroom
        )
        out = pl.pallas_call(
            _emb_onehot_kernel,
            out_shape=jax.ShapeDtypeStruct((Np, Dp), dtype),
            grid=grid,
            in_specs=[
                pl.BlockSpec((tm_eff, 1), lambda i: (i, 0)),
                pl.BlockSpec((Vp, Dp), lambda i: (0, 0)),   # resident table
            ],
            out_specs=pl.BlockSpec((tm_eff, Dp), lambda i: (i, 0)),
            compiler_params=pltpu.CompilerParams(
                dimension_semantics=("parallel",),
                vmem_limit_bytes=int(min(max(vmem_need, 16 << 20), 64 << 20)),
            ),
            cost_estimate=pl.CostEstimate(
                flops=2 * Np * Vp * Dp,
                transcendentals=0,
                bytes_accessed=Np * 4 + Vp * Dp * itemsize + Np * Dp * itemsize,
            ),
        )(ids2d, table_p)
    else:
        table_p = table if Dp == D else jnp.pad(table, ((0, 0), (0, Dp - D)))
        vmem_need = 4 * tm_eff * Dp * itemsize + (4 << 20)
        out = pl.pallas_call(
            _emb_hbm_gather_kernel,
            out_shape=jax.ShapeDtypeStruct((Np, Dp), dtype),
            grid_spec=pltpu.PrefetchScalarGridSpec(
                num_scalar_prefetch=1,                          # ids -> SMEM
                grid=grid,
                in_specs=[pl.BlockSpec(memory_space=pl.ANY)],   # table in HBM
                out_specs=pl.BlockSpec((tm_eff, Dp), lambda i, ids_ref: (i, 0)),
                scratch_shapes=[pltpu.SemaphoreType.DMA(())],
            ),
            compiler_params=pltpu.CompilerParams(
                dimension_semantics=("parallel",),
                vmem_limit_bytes=int(min(max(vmem_need, 16 << 20), 64 << 20)),
            ),
            cost_estimate=pl.CostEstimate(
                flops=0,
                transcendentals=0,
                bytes_accessed=2 * Np * Dp * itemsize + Np * 4,
            ),
        )(ids, table_p)

    return out[:N, :D].reshape(B, S, D)


def make_embedding_table(key, vocab_size, word_dim, padding_idx):
    # xavier_uniform-style deterministic init (as in BasicModule.init_param)
    limit = (6.0 / (vocab_size + word_dim)) ** 0.5
    table = jax.random.uniform(
        key, (vocab_size, word_dim), minval=-limit, maxval=limit,
        dtype=jnp.float32,
    )
    # nn.Embedding(padding_idx=...) zeroes that row; forward just reads it.
    table = table.at[padding_idx].set(0.0)
    return table


if __name__ == "__main__":
    # shapes consistent with the module: args.vocab_size, args.word_dim, args._ipad
    vocab_size, word_dim, padding_idx = 64, 32, 0
    batch, seq = 2, 8

    key = jax.random.PRNGKey(0)
    k_tab, k_idx, k_tab2, k_idx2 = jax.random.split(key, 4)

    # --- fast (VMEM-resident one-hot) path -----------------------------------
    table = make_embedding_table(k_tab, vocab_size, word_dim, padding_idx)
    review = jax.random.randint(k_idx, (batch, seq), 0, vocab_size, dtype=jnp.int32)
    review = review.at[0, 0].set(padding_idx)
    review = review.at[1, 3].set(padding_idx)

    out = jax.block_until_ready(word_emb_forward(review, table))
    ref = jnp.take(table, review, axis=0)
    assert out.shape == (batch, seq, word_dim)
    assert jnp.allclose(out, ref, atol=1e-6), "mismatch vs reference embedding (fast path)"
    assert jnp.allclose(out[0, 0], 0.0), "padding row must be zero"

    # --- large-vocab (HBM row-gather) path ------------------------------------
    vocab2, dim2 = 512, 96
    table2 = make_embedding_table(k_tab2, vocab2, dim2, padding_idx)
    review2 = jax.random.randint(k_idx2, (2, 24), 0, vocab2, dtype=jnp.int32)
    out2 = jax.block_until_ready(
        word_emb_forward(review2, table2, force_hbm_gather=True)
    )
    ref2 = jnp.take(table2, review2, axis=0)
    assert out2.shape == (2, 24, dim2)
    assert jnp.allclose(out2, ref2, atol=1e-6), "mismatch vs reference embedding (HBM path)"

    print("KERNEL_OK")
</pallas_src>

<mosaic_0001>
module attributes {stable_mosaic.version = 11 : i64} {
  func.func @_emb_onehot_kernel(%arg0: i32, %arg1: memref<8x1xi32, #tpu.memory_space<vmem>>, %arg2: memref<64x128xf32, #tpu.memory_space<vmem>>, %arg3: memref<8x128xf32, #tpu.memory_space<vmem>>) attributes {dimension_semantics = [#tpu.dimension_semantics<parallel>], iteration_bounds = array<i64: 2>, scalar_prefetch = 0 : i64, scratch_operands = 0 : i64, tpu.core_type = #tpu.core_type<tc>, window_params = [{transform_indices = @transform_0, window_bounds = array<i64: 8, 1>}, {pipeline_mode = #tpu.pipeline_mode<synchronous>, transform_indices = @transform_1, window_bounds = array<i64: 64, 128>}, {transform_indices = @transform_2, window_bounds = array<i64: 8, 128>}]} {
    %c0 = arith.constant 0 : index
    %c0_0 = arith.constant 0 : index
    %0 = vector.load %arg1[%c0, %c0_0] : memref<8x1xi32, #tpu.memory_space<vmem>>, vector<8x1xi32>
    %1 = tpu.iota {dimensions = array<i32: 1>} : vector<8x64xi32>
    %2 = vector.broadcast %0 : vector<8x1xi32> to vector<8x64xi32>
    %3 = arith.cmpi eq, %2, %1 : vector<8x64xi32>
    %4 = arith.extui %3 : vector<8x64xi1> to vector<8x64xi32>
    %5 = arith.sitofp %4 : vector<8x64xi32> to vector<8x64xf32>
    %c0_1 = arith.constant 0 : index
    %c0_2 = arith.constant 0 : index
    %6 = vector.load %arg2[%c0_1, %c0_2] : memref<64x128xf32, #tpu.memory_space<vmem>>, vector<64x128xf32>
    %cst = arith.constant dense<0.000000e+00> : vector<8x128xf32>
    %7 = tpu.matmul %5, %6, %cst {dimension_numbers = #tpu.dot_dimension_numbers<[1], [0], [0], [1], [0, 0, 1, 1], [], []>} : vector<8x64xf32>, vector<64x128xf32>, vector<8x128xf32> -> vector<8x128xf32>
    %c0_3 = arith.constant 0 : index
    %c0_4 = arith.constant 0 : index
    %8 = vector.load %arg3[%c0_3, %c0_4] : memref<8x128xf32, #tpu.memory_space<vmem>>, vector<8x128xf32>
    tpu.vector_store %arg3[%c0_3, %c0_4], %7 {strides = array<i32>} : memref<8x128xf32, #tpu.memory_space<vmem>>, vector<8x128xf32>,
    return
  }
  func.func @transform_0(%arg0: i32) -> (i32, i32) {
    %c0_i32 = arith.constant 0 : i32
    %c0_i32_0 = arith.constant 0 : i32
    return %arg0, %c0_i32 : i32, i32
  }
  func.func @transform_1(%arg0: i32) -> (i32, i32) {
    %c0_i32 = arith.constant 0 : i32
    %c0_i32_0 = arith.constant 0 : i32
    %c0_i32_1 = arith.constant 0 : i32
    return %c0_i32, %c0_i32_0 : i32, i32
  }
  func.func @transform_2(%arg0: i32) -> (i32, i32) {
    %c0_i32 = arith.constant 0 : i32
    %c0_i32_0 = arith.constant 0 : i32
    return %arg0, %c0_i32 : i32, i32
  }
}

</mosaic_0001>

<bundles_post_ra>
// kernel: tpu_custom_call.1
= control target key start
LH: loop header
LB: loop body
LE: loop exit
PB: predicated region body
PF: predicated region fallthrough
CT: control target
= control target key end

     0   :  { %7 = vsyncpa [#allocation3], 0  ;;  %s696_s0 = inlined_call_operand.vmem [shape: s32[16,1], index: 0, kind: input, shape index: {}]   ;;  %s697_s1 = inlined_call_operand.hbm [shape: f32[64,128], index: 1, kind: input, shape index: {}]   ;;  %s698_s2 = inlined_call_operand.hbm [shape: f32[16,128], index: 2, kind: output, shape index: {}]  }
   0x1   :  { %8 = vsyncpa [#allocation4], 0 }
   0x2   :  { %10 = vsyncpa [#allocation4 + $0x1], 0  ;;  %s561_s9 = smov 0   ;;  %s563_s10 = smov 0  }
   0x3   :  { %s565_s11 = smov 0   ;;  %s567_s12 = smov 0  }
   0x4 LB: > { %s582_s13 = sadd.s32 4294967295, %s536_s12   ;;  %s331_s14 = sadd.s32 4294967294, %s536_s12   ;;  %s536_s12 = sphi %s567_s12, %s714_s12   ;;  %s532_s11 = sphi %s565_s11, %s713_s11   ;;  %s528_s10 = sphi %s563_s10, %s712_s10   ;;  %s524_s9 = sphi %s561_s9, %s711_s9  }
   0x5   : > { %s586_s15 = sadd.s32 1, %s536_s12   ;;  %s70_s16 = sadd.s32 1, %s532_s11 }
   0x6   : > { %s67_s17 = ssub.s32 %s536_s12, %s586_s15  ;;  %p80_p0 = scmp.ne.s32.totalorder %s532_s11, %s528_s10 }
   0x7   : > { %p68_p1 = scmp.eq.s32.totalorder %s67_s17, 0  ;;  %p81_p2 = scmp.eq.s32.totalorder %s582_s13, 1 }
   0x8   : > { %p86_p3 = scmp.ne.s32.totalorder %s528_s10, %s524_s9  ;;  %p87_p4 = scmp.eq.s32.totalorder %s331_s14, 1 }
   0x9   : > { %s597_s18 = scalar_select %p68_p1, %s532_s11, %s70_s16  }
   0xa   : > { %p599_p5 = por %p81_p2, %p80_p0  ;;  %p603_p6 = por %p87_p4, %p86_p3 }
   0xb   : > { %p332_p7 = scmp.ge.s32.totalorder %s536_s12, 1  ;;  %p94_p8 = scmp.lt.s32.totalorder %s536_s12, 3 }
   0xc   : > { %s702_s19 = scalar_select %p599_p5, 1, 0 }
   0xd   : > { %s703_s20 = scalar_select %p603_p6, 1, 0 }
   0xe   : > { %p699_p9 = scmp.eq.s32.totalorder %s582_s13, 0  ;;  %p610_p10 = pnand %p332_p7, %p94_p8 }
   0xf   : > { %s538_s22 = smov [#allocation2]   ;;  %s442_s27 = scalar_lea.hbm %s697_s1, 1024 }
  0x10   : > { %s704_s21 = scalar_select %p610_p10, 1, 0 }
  0x11   : > { %s106_s23 = sshll.u32 %s538_s22, 4  ;;  %p391_p11 = pneg %p610_p10  ;;  %s107_s23 = int_to_ptr.vmem [resolvable:$true] %s106_s23 }
  0x12   : > { %p443_p13 = scmp.ne.s32.totalorder %s697_s1, %s442_s27  ;;  %p449_p3 = scmp.lt.u32.totalorder %s442_s27, %s697_s1 }
  0x13   : > { %p618_p12 = pnand %p699_p9, %p391_p11 }
  0x15   : > { %p444_p0 = pneg %p618_p12 }
  0x17   : > { %p445_p1 = pnand %p444_p0, %p443_p13 }
  0x19   : > { %p446_p2 = pneg %p445_p1 }
  0x1b   : > { %p451_p4 = pnand %p449_p3, %p446_p2 }
  0x1d   : > { %454 = shalt.err (!%p451_p4)
}
  0x1e   : > { %s455_s4 = scalar_lea.vmem %s107_s23, 1024  ;;  %p463_p9 = scmp.lt.s32.totalorder %s107_s23, %s107_s23 }
  0x1f   : > { %p456_p7 = scmp.ne.s32.totalorder %s107_s23, %s455_s4  ;;  %p464_p6 = scmp.lt.s32.totalorder %s455_s4, %s455_s4 }
  0x21   : > { %p458_p8 = pnand %p456_p7, %p444_p0  ;;  %p465_p5 = por %p464_p6, %p463_p9 }
  0x23   : > { %p459_p11 = pneg %p458_p8 }
  0x25   : > { %p466_p10 = pnand %p465_p5, %p459_p11 }
  0x27   : > { %469 = shalt.err (!%p466_p10)
}
  0x28   : > { %s539_s5 = smov 128   ;;  %s540_s6 = smov 8  }
  0x29   : > { %394 = dma.hbm_to_vmem [thread:$0]  (!%p618_p12), %s697_s1, 1024, %s107_s23, [#allocation3], %s539_s5, %s539_s5, %s540_s6  }
  0x2a   : > { %p706_p13 = scmp.ne.s32.totalorder %s704_s21, 0 }
  0x2b   : > { %p707_p1 = scmp.eq.s32.totalorder (!%p706_p13), %s582_s13, 0 }
  0x2c   : > { %129 = sbr.rel (%p706_p13) target bundleno = 415 (0x19f), region = 28 }
  0x33   : > { %515 = dma.done.wait (%p707_p1), [#allocation3], 1024   ;;  %p708_p0 = pmov %p707_p1 }
  0x34   : > { %p150_p5 = scmp.lt.s32.totalorder %s582_s13, 1  ;;  %v541_v0 = vmov 0   ;;  %v542_v1 = vmov 0.0|0.0   ;;  %v163_v3 = vld [vmem:[#allocation2] sm:$0xff]  ;;  %v164_v4 = vld [vmem:[#allocation2 + $0x8] sm:$0xff]  ;;  %v165_v6 = vld [vmem:[#allocation2 + $0x10] sm:$0xff]  ;;  %v155_v16 = vlaneseq }
  0x35   : > { %517 = vsyncadd (%p708_p0), [#allocation3], 4294966272  ;;  %441 = vset.pattern.permute.xlu0 %v541_v0  ;;  %373 = vmatprep.subr.bf16.mxu0 %v542_v1  ;;  %v374_v5 = vpack.c.bf16 %v164_v4, %v163_v3  ;;  %v166_v7 = vld [vmem:[#allocation2 + $0x18] sm:$0xff]  ;;  %vm543_vm0 = vmmov 0   ;;  %v544_v8 = vmov 0.0   ;;  %v167_v10 = vld [vmem:[#allocation2 + $0x20] sm:$0xff] }
  0x36   : > { %s151_s14 = scalar_select %p150_p5, %s582_s13, 1  ;;  %370 = vmatprep.mubr.msk.f32.mxu0 %vm543_vm0, %v544_v8  ;;  %v377_v9 = vpack.c.bf16 %v166_v7, %v165_v6  ;;  %v168_v11 = vld [vmem:[#allocation2 + $0x28] sm:$0xff]  ;;  %v169_v13 = vld [vmem:[#allocation2 + $0x30] sm:$0xff]  ;;  %v170_v14 = vld [vmem:[#allocation2 + $0x38] sm:$0xff]  ;;  %v156_v17 = vand.u32 127, %v155_v16  ;;  %vm171_vm1 = vcmask 523264  }
  0x37   : > { %375 = vmatpush3.bf16.msra.mxu0 %v374_v5  ;;  %v380_v12 = vpack.c.bf16 %v168_v11, %v167_v10  ;;  %v383_v15 = vpack.c.bf16 %v170_v14, %v169_v13  ;;  %s147_s23 = sand.u32 1, %s528_s10   ;;  %s342_s27 = sshll.u32 %s582_s13, 7 }
  0x38   : > { %s338_s16 = sshll.u32 %s151_s14, 3  ;;  %376 = vmatprep.subr.bf16.mxu0 %v542_v1  ;;  %s337_s24 = sshll.u32 %s147_s23, 3 }
  0x39   : > { %s153_s21 = scalar_lea.vmem %s696_s0, %s338_s16  ;;  %s149_s25 = scalar_lea.vmem [#allocation5], %s337_s24 }
  0x3a   : > { %v154_v2 = vld [vmem:[%s153_s21] sm:$0xff]  ;;  %s260_s26 = sshll.u32 %s149_s25, 4  ;;  %s656_s30 = scalar_lea.hbm %s698_s2, %s342_s27  ;;  %s651_s26 = int_to_ptr.vmem [resolvable:$true] %s260_s26 }
  0x3b   : > { %158 = vperm.xlu0 %441, %v154_v2   ;;  %378 = vmatpush3.bf16.msra.mxu0 %v377_v9  ;;  %s247_s3 = scalar_lea.sflag [#allocation4], %s147_s23  ;;  %s470_s4 = scalar_lea.vmem %s651_s26, 128 }
  0x3c   : > { %379 = vmatprep.subr.bf16.mxu0 %v542_v1  ;;  %p471_p6 = scmp.ne.s32.totalorder %s651_s26, %s470_s4  ;;  %p709_p9 = scmp.ne.s32.totalorder %s702_s19, 0 }
  0x3d   : > { %s545_s13 = smov [#allocation5]  }
  0x3e   : > { %p472_p10 = pnand %p471_p6, %p709_p9  ;;  %s474_s5 = sshll.u32 %s545_s13, 4  ;;  %s475_s5 = int_to_ptr.vmem [resolvable:$false] %s474_s5 }
  0x3f   : > { %381 = vmatpush3.bf16.msra.mxu0 %v380_v12  ;;  %s476_s6 = scalar_lea.vmem %s475_s5, 256  ;;  %p477_p2 = scmp.lt.s32.totalorder %s651_s26, %s475_s5 }
  0x40   : > { %382 = vmatprep.subr.bf16.mxu0 %v542_v1  ;;  %p473_p12 = pneg %p472_p10  ;;  %p478_p3 = scmp.lt.s32.totalorder %s476_s6, %s470_s4 }
  0x42   : > { %p479_p4 = por %p478_p3, %p477_p2 }
  0x43   : > { %384 = vmatpush3.bf16.msra.mxu0 %v383_v15 }
  0x44   : > { %p480_p7 = pnand %p479_p4, %p473_p12 }
  0xba   : > { %v159_v18 = vpop.permute.xlu0 %158 }
  0xbb   : > { %vm160_vm2 = vcmp.eq.s32.totalorder %v159_v18, %v156_v17 }
  0xbc   : > { %v339_v19 = vsel %vm160_vm2, 1.0, %v544_v8 }
  0xbd   : > { %371 = vmatmul.mubr.msk.f32.vlgmr.msra.gmra.mrb[0].mxu0 %vm171_vm1, %v339_v19 }
 0x190   : > { %v241_v20 = vpop.f32.mrb[0].mxu0 }
 0x191   : > { %245 = vst [vmem:[%s149_s25] sm:$0xff] %v241_v20  ;;  %v372_v21 = vpop.f32.mrb[1].mxu0 }
 0x192   : > { %483 = shalt.err (!%p480_p7)
}
 0x193   : > { %s484_s7 = scalar_lea.hbm %s656_s30, 128  ;;  %s488_s16 = scalar_lea.hbm %s698_s2, 256 }
 0x194   : > { %p485_p8 = scmp.ne.s32.totalorder %s656_s30, %s484_s7  ;;  %p489_p1 = scmp.lt.u32.totalorder %s656_s30, %s698_s2 }
 0x195   : > { %p490_p0 = scmp.lt.u32.totalorder %s488_s16, %s484_s7  ;;  %p492_p6 = scmp.lt.u32.totalorder %s484_s7, %s656_s30 }
 0x196   : > { %p486_p11 = pnand %p485_p8, %p709_p9 }
 0x197   : > { %p491_p5 = por %p490_p0, %p489_p1 }
 0x198   : > { %p487_p13 = pneg %p486_p11 }
 0x199   : > { %p493_p10 = por %p492_p6, %p491_p5 }
 0x19b   : > { %p494_p12 = pnand %p493_p10, %p487_p13 }
 0x19d   : > { %497 = shalt.err (!%p494_p12)
}
 0x19e   : > { %389 = dma.vmem_to_hbm [thread:$0]  (%p709_p9), %s651_s26, 128, %s656_s30, %s247_s3  }
 0x19f PF: > { %p401_p2 = scmp.ge.s32.totalorder %s536_s12, 2  ;;  %s272_s21 = sand.u32 1, %s524_s9  }
 0x1a0   : > { %p710_p3 = scmp.ne.s32.totalorder %s703_s20, 0  ;;  %s273_s23 = scalar_lea.sflag [#allocation4], %s272_s21 }
 0x1a2   : > { %p396_p4 = pnand %p401_p2, %p710_p3 }
 0x1a4   : > { %519 = dma.done.wait (!%p396_p4), %s273_s23, 128  }
 0x1a5   : > { %521 = vsyncadd (!%p396_p4), %s273_s23, 4294967168  ;;  %p13_p7 = scmp.ge.s32.totalorder %s586_s15, 4   ;;  %s711_s9 = smov %s528_s10 }
 0x1a6   : > { %s712_s10 = smov %s532_s11  ;;  %s713_s11 = smov %s597_s18 }
 0x1a7   : > { %s714_s12 = smov %s586_s15  ;;  %15 = sbr.rel (!%p13_p7) target bundleno = 4 (0x4), region = 68 }
 0x1ae   :  { %278 = vsyncpa [#allocation3], 1 }
 0x1af   :  { %280 = vsyncpa [#allocation3 + $0x1], 1 }
 0x1b0   :  { %281 = vsyncpa [#allocation4], 1 }
 0x1b1   :  { %283 = vsyncpa [#allocation4 + $0x1], 1 }

</bundles_post_ra>
